<compile_context>
chip_gen: v7x
topology: tpu7x:2x2x1
jax: 0.10.0
libtpu: 0.0.40
codegen_flags: <defaults>
</compile_context>

<pallas_src>
import jax
import jax.numpy as jnp
from jax.experimental import pallas as pl
from jax.experimental.pallas import tpu as pltpu

ALPHA = 1.0
GAMMA = 2.0


def _round_up(x, m):
    return (x + m - 1) // m * m


def _make_focal_kernel(n_valid, tn, c, g):
    """Kernel closure. n_valid/tn/c/g are trace-time Python ints."""

    def kernel(x_ref, t_ref, o_ref, acc_ref):
        p = pl.program_id(0)          # parallel chunk (TensorCore on v7x)
        ti = pl.program_id(1)         # tile index within the chunk (reduction)
        nt = pl.num_programs(1)

        @pl.when(ti == 0)
        def _init():
            acc_ref[0] = jnp.float32(0.0)

        # Cast after load: bf16 streams at half the HBM bytes; the widening
        # cast rides the VPU underneath the DMA (v5e has no bf16 VPU/EUP).
        x = x_ref[...].astype(jnp.float32)           # (tn, g*c)
        t = t_ref[...]                               # (tn, g) int32

        # Small iotas only: (1, c) class iota + (tn, 1) row iota.
        col = jax.lax.broadcasted_iota(jnp.int32, (1, c), 1)     # (1, c)
        row = jax.lax.broadcasted_iota(jnp.int32, (tn, 1), 0)    # (tn, 1)
        row_base = (p * nt + ti) * tn                            # packed-row base

        tile_sum = jnp.float32(0.0)
        # Static unroll over the G samples packed along the lane axis.
        for gi in range(g):
            xg = x[:, gi * c:(gi + 1) * c]            # (tn, c) static lane slice
            tg = t[:, gi:gi + 1]                      # (tn, 1)

            # Numerically stable per-sample log-sum-exp along the lane axis.
            m = jnp.max(xg, axis=-1, keepdims=True)                               # (tn, 1)
            lse = jnp.log(jnp.sum(jnp.exp(xg - m), axis=-1, keepdims=True)) + m   # (tn, 1)

            # Gather the logit at the target class via a one-hot select.
            tgt = jnp.sum(jnp.where(col == tg, xg, 0.0), axis=-1, keepdims=True)  # (tn, 1)

            nll = lse - tgt                                                       # (tn, 1)

            # Mask padded samples (ragged last tile / packing pad / chunk pad).
            sample = (row_base + row) * g + gi
            nll = jnp.where(sample < n_valid, nll, 0.0)

            tile_sum = tile_sum + jnp.sum(nll)

        acc_ref[0] += tile_sum

        @pl.when(ti == nt - 1)
        def _finish():
            o_ref[0, 0] = acc_ref[0]                 # per-chunk partial NLL sum

    return kernel


def focal_loss(inputs, targets, alpha=ALPHA, gamma=GAMMA, block_rows=None):
    """inputs: (N, C) float logits (f32 or bf16); targets: (N,) int class ids."""
    n, c = inputs.shape
    itemsize = jnp.dtype(inputs.dtype).itemsize

    # ---- lane packing: G samples per 128-lane row (only useful for C < 128).
    g = max(1, min(8, 128 // c)) if c < 128 else 1

    n_g = _round_up(n, g)
    x = inputs
    t = targets.astype(jnp.int32)
    if n_g != n:
        x = jnp.pad(x, ((0, n_g - n), (0, 0)))
        t = jnp.pad(t, ((0, n_g - n),))
    rows = n_g // g
    x = x.reshape(rows, g * c)                       # (rows, g*c)  lane-dense
    t = t.reshape(rows, g)                           # (rows, g)

    # ---- VMEM-budget-driven row tiling (account for (8,128) lane padding).
    try:
        vmem_cap = int(pltpu.get_tpu_info().vmem_capacity_bytes)
    except Exception:                                # pragma: no cover
        vmem_cap = 64 << 20                          # conservative: v7x per-core

    logit_row_bytes = _round_up(g * c, 128) * itemsize
    tgt_row_bytes = _round_up(g, 128) * 4            # int32, lane-padded
    row_bytes = logit_row_bytes + tgt_row_bytes

    if block_rows is None:
        per_buf_budget = min(4 << 20, max(1 << 20, vmem_cap // 16))
        block_rows = per_buf_budget // row_bytes
    block_rows = max(8, min(int(block_rows), 16384) // 8 * 8)
    block_rows = min(block_rows, _round_up(rows, 8))

    # ---- split the reduction into up to 2 parallel chunks (v7x dual TC).
    n_tiles = (rows + block_rows - 1) // block_rows
    n_par = 2 if n_tiles >= 2 else 1
    tiles_per_chunk = _round_up(n_tiles, n_par) // n_par
    rows_pad = n_par * tiles_per_chunk * block_rows
    if rows_pad != rows:
        x = jnp.pad(x, ((0, rows_pad - rows), (0, 0)))
        t = jnp.pad(t, ((0, rows_pad - rows), (0, 0)))

    kernel = _make_focal_kernel(n, block_rows, c, g)

    # Double-buffered inputs (with lane padding) + slack; never exceed the chip.
    vmem_est = 2 * block_rows * row_bytes + (2 << 20)
    vmem_limit = min(vmem_cap, max(32 << 20, vmem_est))

    cost = pl.CostEstimate(
        flops=8 * n * c,                              # sub/exp-add/compare/select/sums
        transcendentals=n * c + n + 2,                # exp per elem, log per row
        bytes_accessed=n * c * itemsize + n * 4 + n_par * 4,
    )

    partial = pl.pallas_call(
        kernel,
        out_shape=jax.ShapeDtypeStruct((n_par, 1), jnp.float32),
        grid_spec=pltpu.PrefetchScalarGridSpec(
            num_scalar_prefetch=0,
            grid=(n_par, tiles_per_chunk),
            in_specs=[
                pl.BlockSpec((block_rows, g * c),
                             lambda p, i: (p * tiles_per_chunk + i, 0)),
                pl.BlockSpec((block_rows, g),
                             lambda p, i: (p * tiles_per_chunk + i, 0)),
            ],
            out_specs=pl.BlockSpec((1, 1), lambda p, i: (p, 0),
                                   memory_space=pltpu.SMEM),
            scratch_shapes=[pltpu.SMEM((1,), jnp.float32)],
        ),
        compiler_params=pltpu.CompilerParams(
            dimension_semantics=("parallel", "arbitrary"),
            vmem_limit_bytes=vmem_limit,
        ),
        cost_estimate=cost,
    )(x, t)

    # Final mean + focal scaling: a few scalar ops, done outside the grid so
    # the per-chunk partial sums can come from different TensorCores.
    ce = jnp.sum(partial) / jnp.float32(n)           # mean CE (reduction='mean')
    pt = jnp.exp(-ce)
    d = 1.0 - pt
    gamma_f = float(gamma)
    if gamma_f == 2.0:
        scale = d * d                                # mul; no pow -> no NaN edge
    elif gamma_f.is_integer():
        scale = jax.lax.integer_pow(d, int(gamma_f))
    else:
        scale = d ** jnp.float32(gamma_f)
    return jnp.float32(alpha) * scale * ce


def _focal_loss_ref(inputs, targets, alpha=ALPHA, gamma=GAMMA):
    # Pure-JAX reference (matches torch: CE(mean) -> focal scaling on the mean).
    logp = jax.nn.log_softmax(inputs.astype(jnp.float32), axis=-1)
    nll = -jnp.take_along_axis(logp, targets[:, None].astype(jnp.int32), axis=-1)
    ce = jnp.mean(nll)
    pt = jnp.exp(-ce)
    return alpha * (1.0 - pt) ** gamma * ce


if __name__ == "__main__":
    key = jax.random.PRNGKey(0)
    k1, k2, k3, k4 = jax.random.split(key, 4)

    N, C = 20, 32  # small synthetic shapes: 20 samples, 32 classes
    logits = jax.random.normal(k1, (N, C), dtype=jnp.float32)
    targets = jax.random.randint(k2, (N,), 0, C, dtype=jnp.int32)

    # Auto-sized single-tile path (packed rows: 20 samples -> 5 rows of 4x32).
    out_auto = jax.block_until_ready(focal_loss(logits, targets))
    # Forced small tile (still single tile here, exercises the pack+mask path).
    out_small = jax.block_until_ready(focal_loss(logits, targets, block_rows=8))
    # bf16 streaming path (half the DMA'd bytes; widened to f32 inside).
    out_bf16 = jax.block_until_ready(
        focal_loss(logits.astype(jnp.bfloat16), targets))

    ref = _focal_loss_ref(logits, targets)
    ref_bf16 = _focal_loss_ref(logits.astype(jnp.bfloat16).astype(jnp.float32),
                               targets)

    assert jnp.allclose(out_auto, ref, rtol=1e-5, atol=1e-6), (out_auto, ref)
    assert jnp.allclose(out_small, ref, rtol=1e-5, atol=1e-6), (out_small, ref)
    assert jnp.allclose(out_bf16, ref_bf16, rtol=1e-3, atol=1e-5), (out_bf16, ref_bf16)

    # Larger ragged case: multi-tile reduction split into 2 parallel chunks
    # (uses both TensorCores on v7x; single-core chips run it sequentially).
    N2 = 200
    logits2 = jax.random.normal(k3, (N2, C), dtype=jnp.float32)
    targets2 = jax.random.randint(k4, (N2,), 0, C, dtype=jnp.int32)
    out2 = jax.block_until_ready(focal_loss(logits2, targets2, block_rows=8))
    ref2 = _focal_loss_ref(logits2, targets2)
    assert jnp.allclose(out2, ref2, rtol=1e-5, atol=1e-6), (out2, ref2)

    print("KERNEL_OK")
</pallas_src>

<mosaic_0001>
module attributes {stable_mosaic.version = 11 : i64} {
  func.func @kernel(%arg0: i32, %arg1: i32, %arg2: memref<8x128xf32, #tpu.memory_space<vmem>>, %arg3: memref<8x4xi32, #tpu.memory_space<vmem>>, %arg4: memref<1x1xf32, #tpu.memory_space<smem>>, %arg5: memref<1xf32, #tpu.memory_space<smem>>) attributes {dimension_semantics = [#tpu.dimension_semantics<parallel>, #tpu.dimension_semantics<arbitrary>], iteration_bounds = array<i64: 1, 1>, scalar_prefetch = 0 : i64, scratch_operands = 1 : i64, tpu.core_type = #tpu.core_type<tc>, window_params = [{transform_indices = @transform_0, window_bounds = array<i64: 8, 128>}, {transform_indices = @transform_1, window_bounds = array<i64: 8, 4>}, {transform_indices = @transform_2, window_bounds = array<i64: 1, 1>}]} {
    %c0_i32 = arith.constant 0 : i32
    %0 = arith.cmpi eq, %arg1, %c0_i32 : i32
    %1 = arith.extui %0 : i1 to i32
    %c0_i32_0 = arith.constant 0 : i32
    %2 = arith.cmpi ne, %1, %c0_i32_0 : i32
    scf.if %2 {
      %cst_40 = arith.constant 0.000000e+00 : f32
      %c0_41 = arith.constant 0 : index
      %152 = memref.load %arg5[%c0_41] : memref<1xf32, #tpu.memory_space<smem>>
      memref.store %cst_40, %arg5[%c0_41] : memref<1xf32, #tpu.memory_space<smem>>
    } else {
    }
    %c0 = arith.constant 0 : index
    %c0_1 = arith.constant 0 : index
    %3 = vector.load %arg2[%c0, %c0_1] : memref<8x128xf32, #tpu.memory_space<vmem>>, vector<8x128xf32>
    %c0_2 = arith.constant 0 : index
    %c0_3 = arith.constant 0 : index
    %4 = vector.load %arg3[%c0_2, %c0_3] : memref<8x4xi32, #tpu.memory_space<vmem>>, vector<8x4xi32>
    %5 = tpu.iota {dimensions = array<i32: 1>} : vector<1x32xi32>
    %6 = tpu.iota {dimensions = array<i32: 0>} : vector<8x1xi32>
    %c1_i32 = arith.constant 1 : i32
    %7 = arith.muli %arg0, %c1_i32 : i32
    %8 = arith.addi %7, %arg1 : i32
    %c8_i32 = arith.constant 8 : i32
    %9 = arith.muli %8, %c8_i32 : i32
    %10 = vector.extract_strided_slice %3 {offsets = [0, 0], sizes = [8, 32], strides = [1, 1]} : vector<8x128xf32> to vector<8x32xf32>
    %11 = vector.extract_strided_slice %4 {offsets = [0, 0], sizes = [8, 1], strides = [1, 1]} : vector<8x4xi32> to vector<8x1xi32>
    %cst = arith.constant dense<0xFF800000> : vector<8xf32>
    %12 = vector.multi_reduction <maximumf>, %10, %cst [1] : vector<8x32xf32> to vector<8xf32>
    %13 = vector.shape_cast %12 : vector<8xf32> to vector<8x1xf32>
    %14 = vector.broadcast %13 : vector<8x1xf32> to vector<8x32xf32>
    %15 = arith.subf %10, %14 : vector<8x32xf32>
    %16 = math.exp %15 : vector<8x32xf32>
    %cst_4 = arith.constant dense<0.000000e+00> : vector<8xf32>
    %17 = vector.multi_reduction <add>, %16, %cst_4 [1] : vector<8x32xf32> to vector<8xf32>
    %18 = vector.shape_cast %17 : vector<8xf32> to vector<8x1xf32>
    %19 = math.log %18 : vector<8x1xf32>
    %20 = arith.addf %19, %13 : vector<8x1xf32>
    %21 = vector.broadcast %5 : vector<1x32xi32> to vector<8x32xi32>
    %22 = vector.broadcast %11 : vector<8x1xi32> to vector<8x32xi32>
    %23 = arith.cmpi eq, %21, %22 : vector<8x32xi32>
    %cst_5 = arith.constant 0.000000e+00 : f32
    %24 = vector.broadcast %cst_5 : f32 to vector<8x32xf32>
    %25 = arith.select %23, %10, %24 : vector<8x32xi1>, vector<8x32xf32>
    %cst_6 = arith.constant dense<0.000000e+00> : vector<8xf32>
    %26 = vector.multi_reduction <add>, %25, %cst_6 [1] : vector<8x32xf32> to vector<8xf32>
    %27 = vector.shape_cast %26 : vector<8xf32> to vector<8x1xf32>
    %28 = arith.subf %20, %27 : vector<8x1xf32>
    %29 = vector.broadcast %9 : i32 to vector<8x1xi32>
    %30 = arith.addi %29, %6 : vector<8x1xi32>
    %c4_i32 = arith.constant 4 : i32
    %31 = vector.broadcast %c4_i32 : i32 to vector<8x1xi32>
    %32 = arith.muli %30, %31 : vector<8x1xi32>
    %c0_i32_7 = arith.constant 0 : i32
    %33 = vector.broadcast %c0_i32_7 : i32 to vector<8x1xi32>
    %34 = arith.addi %32, %33 : vector<8x1xi32>
    %c20_i32 = arith.constant 20 : i32
    %35 = vector.broadcast %c20_i32 : i32 to vector<8x1xi32>
    %36 = arith.cmpi slt, %34, %35 : vector<8x1xi32>
    %cst_8 = arith.constant 0.000000e+00 : f32
    %37 = vector.broadcast %cst_8 : f32 to vector<8x1xf32>
    %38 = arith.select %36, %28, %37 : vector<8x1xi1>, vector<8x1xf32>
    %39 = vector.shape_cast %38 : vector<8x1xf32> to vector<1x8x1xf32>
    %cst_9 = arith.constant dense<0.000000e+00> : vector<1xf32>
    %40 = vector.multi_reduction <add>, %39, %cst_9 [1, 2] : vector<1x8x1xf32> to vector<1xf32>
    %41 = vector.shape_cast %40 : vector<1xf32> to vector<1x1x1xf32>
    %42 = vector.extract %41[0, 0, 0] : f32 from vector<1x1x1xf32>
    %cst_10 = arith.constant 0.000000e+00 : f32
    %43 = arith.addf %cst_10, %42 : f32
    %44 = vector.extract_strided_slice %3 {offsets = [0, 32], sizes = [8, 32], strides = [1, 1]} : vector<8x128xf32> to vector<8x32xf32>
    %45 = vector.extract_strided_slice %4 {offsets = [0, 1], sizes = [8, 1], strides = [1, 1]} : vector<8x4xi32> to vector<8x1xi32>
    %cst_11 = arith.constant dense<0xFF800000> : vector<8xf32>
    %46 = vector.multi_reduction <maximumf>, %44, %cst_11 [1] : vector<8x32xf32> to vector<8xf32>
    %47 = vector.shape_cast %46 : vector<8xf32> to vector<8x1xf32>
    %48 = vector.broadcast %47 : vector<8x1xf32> to vector<8x32xf32>
    %49 = arith.subf %44, %48 : vector<8x32xf32>
    %50 = math.exp %49 : vector<8x32xf32>
    %cst_12 = arith.constant dense<0.000000e+00> : vector<8xf32>
    %51 = vector.multi_reduction <add>, %50, %cst_12 [1] : vector<8x32xf32> to vector<8xf32>
    %52 = vector.shape_cast %51 : vector<8xf32> to vector<8x1xf32>
    %53 = math.log %52 : vector<8x1xf32>
    %54 = arith.addf %53, %47 : vector<8x1xf32>
    %55 = vector.broadcast %5 : vector<1x32xi32> to vector<8x32xi32>
    %56 = vector.broadcast %45 : vector<8x1xi32> to vector<8x32xi32>
    %57 = arith.cmpi eq, %55, %56 : vector<8x32xi32>
    %cst_13 = arith.constant 0.000000e+00 : f32
    %58 = vector.broadcast %cst_13 : f32 to vector<8x32xf32>
    %59 = arith.select %57, %44, %58 : vector<8x32xi1>, vector<8x32xf32>
    %cst_14 = arith.constant dense<0.000000e+00> : vector<8xf32>
    %60 = vector.multi_reduction <add>, %59, %cst_14 [1] : vector<8x32xf32> to vector<8xf32>
    %61 = vector.shape_cast %60 : vector<8xf32> to vector<8x1xf32>
    %62 = arith.subf %54, %61 : vector<8x1xf32>
    %63 = vector.broadcast %9 : i32 to vector<8x1xi32>
    %64 = arith.addi %63, %6 : vector<8x1xi32>
    %c4_i32_15 = arith.constant 4 : i32
    %65 = vector.broadcast %c4_i32_15 : i32 to vector<8x1xi32>
    %66 = arith.muli %64, %65 : vector<8x1xi32>
    %c1_i32_16 = arith.constant 1 : i32
    %67 = vector.broadcast %c1_i32_16 : i32 to vector<8x1xi32>
    %68 = arith.addi %66, %67 : vector<8x1xi32>
    %c20_i32_17 = arith.constant 20 : i32
    %69 = vector.broadcast %c20_i32_17 : i32 to vector<8x1xi32>
    %70 = arith.cmpi slt, %68, %69 : vector<8x1xi32>
    %cst_18 = arith.constant 0.000000e+00 : f32
    %71 = vector.broadcast %cst_18 : f32 to vector<8x1xf32>
    %72 = arith.select %70, %62, %71 : vector<8x1xi1>, vector<8x1xf32>
    %73 = vector.shape_cast %72 : vector<8x1xf32> to vector<1x8x1xf32>
    %cst_19 = arith.constant dense<0.000000e+00> : vector<1xf32>
    %74 = vector.multi_reduction <add>, %73, %cst_19 [1, 2] : vector<1x8x1xf32> to vector<1xf32>
    %75 = vector.shape_cast %74 : vector<1xf32> to vector<1x1x1xf32>
    %76 = vector.extract %75[0, 0, 0] : f32 from vector<1x1x1xf32>
    %77 = arith.addf %43, %76 : f32
    %78 = vector.extract_strided_slice %3 {offsets = [0, 64], sizes = [8, 32], strides = [1, 1]} : vector<8x128xf32> to vector<8x32xf32>
    %79 = vector.extract_strided_slice %4 {offsets = [0, 2], sizes = [8, 1], strides = [1, 1]} : vector<8x4xi32> to vector<8x1xi32>
    %cst_20 = arith.constant dense<0xFF800000> : vector<8xf32>
    %80 = vector.multi_reduction <maximumf>, %78, %cst_20 [1] : vector<8x32xf32> to vector<8xf32>
    %81 = vector.shape_cast %80 : vector<8xf32> to vector<8x1xf32>
    %82 = vector.broadcast %81 : vector<8x1xf32> to vector<8x32xf32>
    %83 = arith.subf %78, %82 : vector<8x32xf32>
    %84 = math.exp %83 : vector<8x32xf32>
    %cst_21 = arith.constant dense<0.000000e+00> : vector<8xf32>
    %85 = vector.multi_reduction <add>, %84, %cst_21 [1] : vector<8x32xf32> to vector<8xf32>
    %86 = vector.shape_cast %85 : vector<8xf32> to vector<8x1xf32>
    %87 = math.log %86 : vector<8x1xf32>
    %88 = arith.addf %87, %81 : vector<8x1xf32>
    %89 = vector.broadcast %5 : vector<1x32xi32> to vector<8x32xi32>
    %90 = vector.broadcast %79 : vector<8x1xi32> to vector<8x32xi32>
    %91 = arith.cmpi eq, %89, %90 : vector<8x32xi32>
    %cst_22 = arith.constant 0.000000e+00 : f32
    %92 = vector.broadcast %cst_22 : f32 to vector<8x32xf32>
    %93 = arith.select %91, %78, %92 : vector<8x32xi1>, vector<8x32xf32>
    %cst_23 = arith.constant dense<0.000000e+00> : vector<8xf32>
    %94 = vector.multi_reduction <add>, %93, %cst_23 [1] : vector<8x32xf32> to vector<8xf32>
    %95 = vector.shape_cast %94 : vector<8xf32> to vector<8x1xf32>
    %96 = arith.subf %88, %95 : vector<8x1xf32>
    %97 = vector.broadcast %9 : i32 to vector<8x1xi32>
    %98 = arith.addi %97, %6 : vector<8x1xi32>
    %c4_i32_24 = arith.constant 4 : i32
    %99 = vector.broadcast %c4_i32_24 : i32 to vector<8x1xi32>
    %100 = arith.muli %98, %99 : vector<8x1xi32>
    %c2_i32 = arith.constant 2 : i32
    %101 = vector.broadcast %c2_i32 : i32 to vector<8x1xi32>
    %102 = arith.addi %100, %101 : vector<8x1xi32>
    %c20_i32_25 = arith.constant 20 : i32
    %103 = vector.broadcast %c20_i32_25 : i32 to vector<8x1xi32>
    %104 = arith.cmpi slt, %102, %103 : vector<8x1xi32>
    %cst_26 = arith.constant 0.000000e+00 : f32
    %105 = vector.broadcast %cst_26 : f32 to vector<8x1xf32>
    %106 = arith.select %104, %96, %105 : vector<8x1xi1>, vector<8x1xf32>
    %107 = vector.shape_cast %106 : vector<8x1xf32> to vector<1x8x1xf32>
    %cst_27 = arith.constant dense<0.000000e+00> : vector<1xf32>
    %108 = vector.multi_reduction <add>, %107, %cst_27 [1, 2] : vector<1x8x1xf32> to vector<1xf32>
    %109 = vector.shape_cast %108 : vector<1xf32> to vector<1x1x1xf32>
    %110 = vector.extract %109[0, 0, 0] : f32 from vector<1x1x1xf32>
    %111 = arith.addf %77, %110 : f32
    %112 = vector.extract_strided_slice %3 {offsets = [0, 96], sizes = [8, 32], strides = [1, 1]} : vector<8x128xf32> to vector<8x32xf32>
    %113 = vector.extract_strided_slice %4 {offsets = [0, 3], sizes = [8, 1], strides = [1, 1]} : vector<8x4xi32> to vector<8x1xi32>
    %cst_28 = arith.constant dense<0xFF800000> : vector<8xf32>
    %114 = vector.multi_reduction <maximumf>, %112, %cst_28 [1] : vector<8x32xf32> to vector<8xf32>
    %115 = vector.shape_cast %114 : vector<8xf32> to vector<8x1xf32>
    %116 = vector.broadcast %115 : vector<8x1xf32> to vector<8x32xf32>
    %117 = arith.subf %112, %116 : vector<8x32xf32>
    %118 = math.exp %117 : vector<8x32xf32>
    %cst_29 = arith.constant dense<0.000000e+00> : vector<8xf32>
    %119 = vector.multi_reduction <add>, %118, %cst_29 [1] : vector<8x32xf32> to vector<8xf32>
    %120 = vector.shape_cast %119 : vector<8xf32> to vector<8x1xf32>
    %121 = math.log %120 : vector<8x1xf32>
    %122 = arith.addf %121, %115 : vector<8x1xf32>
    %123 = vector.broadcast %5 : vector<1x32xi32> to vector<8x32xi32>
    %124 = vector.broadcast %113 : vector<8x1xi32> to vector<8x32xi32>
    %125 = arith.cmpi eq, %123, %124 : vector<8x32xi32>
    %cst_30 = arith.constant 0.000000e+00 : f32
    %126 = vector.broadcast %cst_30 : f32 to vector<8x32xf32>
    %127 = arith.select %125, %112, %126 : vector<8x32xi1>, vector<8x32xf32>
    %cst_31 = arith.constant dense<0.000000e+00> : vector<8xf32>
    %128 = vector.multi_reduction <add>, %127, %cst_31 [1] : vector<8x32xf32> to vector<8xf32>
    %129 = vector.shape_cast %128 : vector<8xf32> to vector<8x1xf32>
    %130 = arith.subf %122, %129 : vector<8x1xf32>
    %131 = vector.broadcast %9 : i32 to vector<8x1xi32>
    %132 = arith.addi %131, %6 : vector<8x1xi32>
    %c4_i32_32 = arith.constant 4 : i32
    %133 = vector.broadcast %c4_i32_32 : i32 to vector<8x1xi32>
    %134 = arith.muli %132, %133 : vector<8x1xi32>
    %c3_i32 = arith.constant 3 : i32
    %135 = vector.broadcast %c3_i32 : i32 to vector<8x1xi32>
    %136 = arith.addi %134, %135 : vector<8x1xi32>
    %c20_i32_33 = arith.constant 20 : i32
    %137 = vector.broadcast %c20_i32_33 : i32 to vector<8x1xi32>
    %138 = arith.cmpi slt, %136, %137 : vector<8x1xi32>
    %cst_34 = arith.constant 0.000000e+00 : f32
    %139 = vector.broadcast %cst_34 : f32 to vector<8x1xf32>
    %140 = arith.select %138, %130, %139 : vector<8x1xi1>, vector<8x1xf32>
    %141 = vector.shape_cast %140 : vector<8x1xf32> to vector<1x8x1xf32>
    %cst_35 = arith.constant dense<0.000000e+00> : vector<1xf32>
    %142 = vector.multi_reduction <add>, %141, %cst_35 [1, 2] : vector<1x8x1xf32> to vector<1xf32>
    %143 = vector.shape_cast %142 : vector<1xf32> to vector<1x1x1xf32>
    %144 = vector.extract %143[0, 0, 0] : f32 from vector<1x1x1xf32>
    %145 = arith.addf %111, %144 : f32
    %c0_36 = arith.constant 0 : index
    %146 = memref.load %arg5[%c0_36] : memref<1xf32, #tpu.memory_space<smem>>
    %147 = arith.addf %146, %145 : f32
    %c0_37 = arith.constant 0 : index
    %148 = memref.load %arg5[%c0_37] : memref<1xf32, #tpu.memory_space<smem>>
    memref.store %147, %arg5[%c0_37] : memref<1xf32, #tpu.memory_space<smem>>
    %c0_i32_38 = arith.constant 0 : i32
    %149 = arith.cmpi eq, %arg1, %c0_i32_38 : i32
    %150 = arith.extui %149 : i1 to i32
    %c0_i32_39 = arith.constant 0 : i32
    %151 = arith.cmpi ne, %150, %c0_i32_39 : i32
    scf.if %151 {
      %c0_40 = arith.constant 0 : index
      %152 = memref.load %arg5[%c0_40] : memref<1xf32, #tpu.memory_space<smem>>
      %c0_41 = arith.constant 0 : index
      %c0_42 = arith.constant 0 : index
      %153 = memref.load %arg4[%c0_41, %c0_42] : memref<1x1xf32, #tpu.memory_space<smem>>
      memref.store %152, %arg4[%c0_41, %c0_42] : memref<1x1xf32, #tpu.memory_space<smem>>
    } else {
    }
    return
  }
  func.func @transform_0(%arg0: i32, %arg1: i32) -> (i32, i32) {
    %c1_i32 = arith.constant 1 : i32
    %0 = arith.muli %arg0, %c1_i32 : i32
    %1 = arith.addi %0, %arg1 : i32
    %c0_i32 = arith.constant 0 : i32
    %c0_i32_0 = arith.constant 0 : i32
    return %1, %c0_i32 : i32, i32
  }
  func.func @transform_1(%arg0: i32, %arg1: i32) -> (i32, i32) {
    %c1_i32 = arith.constant 1 : i32
    %0 = arith.muli %arg0, %c1_i32 : i32
    %1 = arith.addi %0, %arg1 : i32
    %c0_i32 = arith.constant 0 : i32
    %c0_i32_0 = arith.constant 0 : i32
    return %1, %c0_i32 : i32, i32
  }
  func.func @transform_2(%arg0: i32, %arg1: i32) -> (i32, i32) {
    %c0_i32 = arith.constant 0 : i32
    %c0_i32_0 = arith.constant 0 : i32
    return %arg0, %c0_i32 : i32, i32
  }
}

</mosaic_0001>

<bundles_post_ra>
// kernel: tpu_custom_call.1
= control target key start
LH: loop header
LB: loop body
LE: loop exit
PB: predicated region body
PF: predicated region fallthrough
CT: control target
= control target key end

     0   :  { %vm99_vm0 = vcmask 523520   ;;  %vm143_vm1 = vcmask 785920   ;;  %vm186_vm2 = vcmask 1048320   ;;  %vm60_vm3 = vcmask 261120   ;;  %s379_s0 = inlined_call_operand.vmem [shape: f32[8,128], index: 0, kind: input, shape index: {}]   ;;  %s380_s1 = inlined_call_operand.vmem [shape: s32[8,4], index: 1, kind: input, shape index: {}]   ;;  %s381_s2 = inlined_call_operand.hbm [shape: f32[1,1], index: 2, kind: output, shape index: {}]  }
   0x1   :  { %v52_v0 = vld [vmem:[%s379_s0] sm:$0xff] }
   0x2   :  { %v100_v1 = vsel %vm99_vm0, %v52_v0, -inf  ;;  %v187_v2 = vsel %vm186_vm2, %v52_v0, -inf }
   0x3   :  { %7 = vsyncpa [#allocation4], 0  ;;  %101 = vmax.xlane.f32.xlu0 %v100_v1  ;;  %188 = vmax.xlane.f32.xlu1 %v187_v2  ;;  %v144_v3 = vsel %vm143_vm1, %v52_v0, -inf  ;;  %v61_v4 = vsel %vm60_vm3, %v52_v0, -inf  ;;  %v313_v5 = vmov 0   ;;  %v53_v6 = vld [vmem:[%s380_s1] sm:$0xff]  ;;  %v54_v25 = vlaneseq }
   0x4   :  { %280 = vset.pattern.permute.xlu1 %v313_v5  ;;  %v314_v7 = vmov 1   ;;  %v315_v8 = vmov 2   ;;  %s316_s0 = smov 96   ;;  %s317_s1 = smov 64   ;;  %v319_v21 = vmov 3   ;;  %vm87_vm9 = vcmask 7168  }
   0x5   :  { %281 = vset.pattern.permute.xlu0 %v314_v7  ;;  %s318_s13 = smov 32   ;;  %v55_v26 = vand.u32 127, %v54_v25  ;;  %v57_v51 = vshrl.u32 %v54_v25, 7  ;;  %s301_s23 = scalar_lea.hbm %s381_s2, 16 }
   0x6   :  { %p302_p0 = scmp.ne.s32.totalorder %s381_s2, %s301_s23  ;;  %p305_p1 = scmp.lt.u32.totalorder %s301_s23, %s381_s2 }
   0x7   :  { %145 = vmax.xlane.f32.xlu0 %v144_v3  ;;  %62 = vmax.xlane.f32.xlu1 %v61_v4  ;;  %v84_v53 = vmul.u32 4, %v57_v51 }
   0x8   :  { %p307_p2 = pnand %p305_p1, %p302_p0 }
   0x9   :  { %vm85_vm8 = vcmp.lt.s32.totalorder %v84_v53, 20  ;;  %v129_v1 = vadd.s32 1, %v84_v53 }
   0xb   :  { %vm130_vm10 = vcmp.lt.s32.totalorder %v129_v1, 20 }
  0x18   :  { %74 = vperm.xlu1 %280, %v53_v6  }
  0x1c   :  { %282 = vset.pattern.permute.xlu1 %v315_v8 }
  0x90   :  { %v343_v9 = vpop.xlane.xlu0 %101  ;;  %v345_v10 = vpop.xlane.xlu1 %188 }
  0x91   :  { %v103_v11 = vsub.f32 %v52_v0, %v343_v9  ;;  %v190_v13 = vsub.f32 %v52_v0, %v345_v10 }
  0x93   :  { %v104_v12 = vmul.f32 1.442695, %v103_v11  ;;  %v191_v17 = vmul.f32 1.442695, %v190_v13 }
  0x94   :  { %v349_v14 = vpop.xlane.xlu0 %145  ;;  %v63_v22 = vpop.xlane.xlu1 %62 }
  0x95   :  { %285 = vpow2.f32 %v104_v12  ;;  %v147_v15 = vsub.f32 %v52_v0, %v349_v14  ;;  %v64_v23 = vsub.f32 %v52_v0, %v63_v22  ;;  %v215_v12 = vadd.s32 3, %v84_v53 }
  0x97   :  { %v148_v16 = vmul.f32 1.442695, %v147_v15  ;;  %v65_v24 = vmul.f32 1.442695, %v64_v23  ;;  %vm216_vm11 = vcmp.lt.s32.totalorder %v215_v12, 20 }
  0x98   :  { %v75_v27 = vpop.permute.xlu1 %74 }
  0x99   :  { %287 = vpow2.f32 %v148_v16  ;;  %vm76_vm4 = vcmp.eq.s32.totalorder %v55_v26, %v75_v27  ;;  %v172_v16 = vadd.s32 2, %v84_v53 }
  0x9a   :  { %289 = vpow2.f32 %v191_v17  ;;  %v77_v30 = vsel %vm76_vm4, %v52_v0, 0.0 }
  0x9b   :  { %291 = vpow2.f32 %v65_v24  ;;  %v78_v31 = vsel %vm60_vm3, %v77_v30, 0.0  ;;  %vm173_vm12 = vcmp.lt.s32.totalorder %v172_v16, 20 }
  0x9f   :  { %v286_v18 = vpop.eup %285 }
  0xa0   :  { %107 = vrot.lane.b32.xlu0 %v286_v18, %s316_s0 }
  0xa3   :  { %v288_v19 = vpop.eup %287 }
  0xa4   :  { %117 = vperm.xlu0 %281, %v53_v6   ;;  %151 = vrot.lane.b32.xlu1 %v288_v19, %s317_s1  ;;  %v290_v20 = vpop.eup %289 }
  0xa5   :  { %v292_v28 = vpop.eup %291 }
  0xa6   :  { %v67_v29 = vsel %vm60_vm3, %v292_v28, 0.0 }
  0xa8   :  { %194 = vrot.lane.b32.xlu1 %v290_v20, %s318_s13  ;;  %121 = vrot.lane.b32.xlu0 %v52_v0, %s316_s0 }
  0xa9   :  { %284 = vset.pattern.permute.xlu0 %v319_v21 }
  0xac   :  { %161 = vperm.xlu1 %282, %v53_v6   ;;  %207 = vrot.lane.b32.xlu0 %v52_v0, %s318_s13 }
  0xb0   :  { %283 = vset.pattern.permute.xlu1 %v319_v21 }
  0xb1   :  { %204 = vperm.xlu1 %283, %v53_v6  }
  0xb5   :  { %164 = vrot.lane.b32.xlu1 %v52_v0, %s317_s1 }
  0xd9   :  { %68 = vadd.xlane.f32.xlu1 %v67_v29 }
  0xdd   :  { %79 = vadd.xlane.f32.xlu1 %v78_v31 }
 0x112   :  { %v108_v32 = vpop.permute.xlu0 %107 }
 0x113   :  { %v110_v33 = vsel %vm60_vm3, %v108_v32, 0.0 }
 0x114   :  { %111 = vadd.xlane.f32.xlu0 %v110_v33 }
 0x116   :  { %v152_v34 = vpop.permute.xlu1 %151 }
 0x117   :  { %v154_v35 = vsel %vm60_vm3, %v152_v34, 0.0 }
 0x118   :  { %155 = vadd.xlane.f32.xlu0 %v154_v35 }
 0x11a   :  { %v195_v36 = vpop.permute.xlu1 %194 }
 0x11b   :  { %v197_v37 = vsel %vm60_vm3, %v195_v36, 0.0 }
 0x11c   :  { %198 = vadd.xlane.f32.xlu0 %v197_v37 }
 0x123   :  { %v118_v38 = vpop.permute.xlu0 %117 }
 0x124   :  { %vm119_vm5 = vcmp.eq.s32.totalorder %v55_v26, %v118_v38 }
 0x127   :  { %v122_v39 = vpop.permute.xlu0 %121 }
 0x128   :  { %v124_v40 = vsel %vm119_vm5, %v122_v39, 0.0 }
 0x129   :  { %v125_v41 = vsel %vm60_vm3, %v124_v40, 0.0 }
 0x12a   :  { %126 = vadd.xlane.f32.xlu0 %v125_v41 }
 0x12b   :  { %v162_v42 = vpop.permute.xlu1 %161  ;;  %v208_v43 = vpop.permute.xlu0 %207 }
 0x12c   :  { %vm163_vm7 = vcmp.eq.s32.totalorder %v55_v26, %v162_v42 }
 0x130   :  { %v205_v44 = vpop.permute.xlu1 %204 }
 0x131   :  { %vm206_vm6 = vcmp.eq.s32.totalorder %v55_v26, %v205_v44 }
 0x132   :  { %v210_v45 = vsel %vm206_vm6, %v208_v43, 0.0 }
 0x133   :  { %v211_v46 = vsel %vm60_vm3, %v210_v45, 0.0 }
 0x134   :  { %212 = vadd.xlane.f32.xlu0 %v211_v46  ;;  %v165_v47 = vpop.permute.xlu1 %164 }
 0x135   :  { %v167_v48 = vsel %vm163_vm7, %v165_v47, 0.0 }
 0x136   :  { %v168_v49 = vsel %vm60_vm3, %v167_v48, 0.0 }
 0x137   :  { %169 = vadd.xlane.f32.xlu1 %v168_v49 }
 0x166   :  { %v69_v50 = vpop.xlane.xlu1 %68 }
 0x167   :  { %293 = vlog2.f32 %v69_v50 }
 0x16a   :  { %v80_v55 = vpop.xlane.xlu1 %79 }
 0x171   :  { %v294_v52 = vpop.eup %293 }
 0x172   :  { %v71_v54 = vmul.f32 0.6931472, %v294_v52 }
 0x174   :  { %v72_v56 = vadd.f32 %v71_v54, %v63_v22 }
 0x176   :  { %v81_v57 = vsub.f32 %v72_v56, %v80_v55 }
 0x178   :  { %v86_v58 = vsel %vm85_vm8, %v81_v57, 0.0 }
 0x179   :  { %v88_v59 = vsel %vm87_vm9, %v86_v58, 0.0 }
 0x17a   :  { %89 = vadd.xlane.f32.xlu1 %v88_v59 }
 0x1a1   :  { %v112_v60 = vpop.xlane.xlu0 %111 }
 0x1a2   :  { %295 = vlog2.f32 %v112_v60 }
 0x1a5   :  { %v156_v61 = vpop.xlane.xlu0 %155 }
 0x1a9   :  { %v199_v62 = vpop.xlane.xlu0 %198 }
 0x1aa   :  { %297 = vlog2.f32 %v199_v62 }
 0x1ab   :  { %299 = vlog2.f32 %v156_v61 }
 0x1ac   :  { %v296_v63 = vpop.eup %295 }
 0x1ad   :  { %v114_v0 = vmul.f32 0.6931472, %v296_v63 }
 0x1af   :  { %v115_v2 = vadd.f32 %v114_v0, %v343_v9 }
 0x1b4   :  { %v298_v5 = vpop.eup %297 }
 0x1b5   :  { %v300_v8 = vpop.eup %299  ;;  %v201_v11 = vmul.f32 0.6931472, %v298_v5 }
 0x1b6   :  { %v158_v13 = vmul.f32 0.6931472, %v300_v8 }
 0x1b7   :  { %v127_v3 = vpop.xlane.xlu0 %126  ;;  %v202_v15 = vadd.f32 %v201_v11, %v345_v10 }
 0x1b8   :  { %v128_v4 = vsub.f32 %v115_v2, %v127_v3  ;;  %v159_v9 = vadd.f32 %v158_v13, %v349_v14 }
 0x1ba   :  { %v131_v6 = vsel %vm130_vm10, %v128_v4, 0.0 }
 0x1bb   :  { %v132_v7 = vsel %vm87_vm9, %v131_v6, 0.0 }
 0x1bc   :  { %133 = vadd.xlane.f32.xlu0 %v132_v7 }
 0x1c1   :  { %v213_v17 = vpop.xlane.xlu0 %212 }
 0x1c2   :  { %v214_v18 = vsub.f32 %v202_v15, %v213_v17 }
 0x1c4   :  { %v170_v19 = vpop.xlane.xlu1 %169  ;;  %v217_v20 = vsel %vm216_vm11, %v214_v18, 0.0 }
 0x1c5   :  { %v171_v21 = vsub.f32 %v159_v9, %v170_v19  ;;  %v218_v22 = vsel %vm87_vm9, %v217_v20, 0.0 }
 0x1c6   :  { %219 = vadd.xlane.f32.xlu0 %v218_v22 }
 0x1c7   :  { %v174_v23 = vsel %vm173_vm12, %v171_v21, 0.0 }
 0x1c8   :  { %v175_v24 = vsel %vm87_vm9, %v174_v23, 0.0 }
 0x1c9   :  { %176 = vadd.xlane.f32.xlu1 %v175_v24 }
 0x207   :  { %v90_v25 = vpop.xlane.xlu1 %89 }
 0x208   :  { %v91_v26 = vrot.slane %v90_v25, 4 }
 0x20a   :  { %v92_v10 = vadd.f32 %v91_v26, %v90_v25 }
 0x20c   :  { %v93_v27 = vrot.slane %v92_v10, 2 }
 0x20e   :  { %v94_v28 = vadd.f32 %v93_v27, %v92_v10 }
 0x210   :  { %v95_v29 = vrot.slane %v94_v28, 1 }
 0x212   :  { %v96_v30 = vadd.f32 %v95_v29, %v94_v28 }
 0x214   :  { %264 = vpush %v96_v30 }
 0x245   :  { %s265_s14 = spop %264 }
 0x249   :  { %v134_v14 = vpop.xlane.xlu0 %133 }
 0x24a   :  { %v135_v31 = vrot.slane %v134_v14, 4 }
 0x24c   :  { %v136_v32 = vadd.f32 %v135_v31, %v134_v14 }
 0x24e   :  { %v137_v33 = vrot.slane %v136_v32, 2 }
 0x250   :  { %v138_v34 = vadd.f32 %v137_v33, %v136_v32 }
 0x252   :  { %v139_v35 = vrot.slane %v138_v34, 1 }
 0x253   :  { %v220_v36 = vpop.xlane.xlu0 %219 }
 0x254   :  { %v221_v37 = vrot.slane %v220_v36, 4  ;;  %v140_v38 = vadd.f32 %v139_v35, %v138_v34 }
 0x256   :  { %v222_v39 = vadd.f32 %v221_v37, %v220_v36  ;;  %266 = vpush %v140_v38  ;;  %v177_v40 = vpop.xlane.xlu1 %176 }
 0x257   :  { %v178_v41 = vrot.slane %v177_v40, 4 }
 0x258   :  { %v223_v42 = vrot.slane %v222_v39, 2 }
 0x259   :  { %v179_v43 = vadd.f32 %v178_v41, %v177_v40 }
 0x25a   :  { %v224_v44 = vadd.f32 %v223_v42, %v222_v39 }
 0x25b   :  { %v180_v45 = vrot.slane %v179_v43, 2 }
 0x25c   :  { %v225_v47 = vrot.slane %v224_v44, 1 }
 0x25d   :  { %v181_v46 = vadd.f32 %v180_v45, %v179_v43 }
 0x25e   :  { %v226_v50 = vadd.f32 %v225_v47, %v224_v44 }
 0x25f   :  { %v182_v48 = vrot.slane %v181_v46, 1 }
 0x261   :  { %v183_v49 = vadd.f32 %v182_v48, %v181_v46 }
 0x263   :  { %268 = vpush %v183_v49 }
 0x264   :  { %270 = vpush %v226_v50 }
 0x287   :  { %s267_s15 = spop %266 }
 0x288   :  { %s142_s16 = sadd.f32 %s267_s15, %s265_s14 }
 0x294   :  { %s269_s17 = spop %268 }
 0x295   :  { %s185_s18 = sadd.f32 %s269_s17, %s142_s16  ;;  %s271_s19 = spop %270 }
 0x297   :  { %s228_s20 = sadd.f32 %s271_s19, %s185_s18 }
 0x299   :  { %238 = sst [smem:[#allocation3]] %s228_s20 }
 0x29a   :  { %310 = shalt.err (!%p307_p2)
}
 0x29b   :  { %s320_s28 = smov [#allocation3]  }
 0x29c   :  { %246 = dma.smem_to_hbm %s320_s28, 16, %s381_s2, [#allocation4]  }
 0x29d   :  { %311 = dma.done.wait [#allocation4], 16  }
 0x29e   :  { %312 = vsyncadd [#allocation4], 4294967280 }
 0x29f   :  { %250 = sfence }
 0x2a0   :  { %251 = vsyncpa [#allocation4], 1 }

</bundles_post_ra>
